<compile_context>
chip_gen: v7x
topology: tpu7x:2x2x1
jax: 0.10.0
libtpu: 0.0.40
codegen_flags: <defaults>
</compile_context>

<pallas_src>
import math

import jax
import jax.numpy as jnp
from jax.experimental import pallas as pl
from jax.experimental.pallas import tpu as pltpu


# ----------------------------------------------------------------------------
# Pallas kernel
# ----------------------------------------------------------------------------
def cnn_cell_kernel(p_ref, w_ref, b_ref, o_ref):
    """conv-as-matmul + (BN-folded) bias + tanh + MaxPool2d(2) for one image.

    p_ref : (K, 4*Hp*Wp)   im2col patches, columns ordered (phase, hp, wp)
    w_ref : (Cout, K)      BN-folded conv weight
    b_ref : (Cout, 1)      BN-folded conv bias
    o_ref : (Cout, Hp*Wp)  pooled activations (channel-major == NCHW flatten)
    """
    hw = o_ref.shape[-1]  # Hp*Wp
    # Single MXU dot covering all 4 pooling phases of this image.
    z = jnp.dot(w_ref[...], p_ref[...], preferred_element_type=jnp.float32)
    z = jnp.tanh(z + b_ref[...])                               # (Cout, 4*Hp*Wp)
    # MaxPool2d(2): max over the 4 phase groups (consecutive lane slices).
    m01 = jnp.maximum(z[:, 0 * hw:1 * hw], z[:, 1 * hw:2 * hw])
    m23 = jnp.maximum(z[:, 2 * hw:3 * hw], z[:, 3 * hw:4 * hw])
    o_ref[...] = jnp.maximum(m01, m23)


# ----------------------------------------------------------------------------
# Wrapper (padding / im2col / BN folding stay in plain JAX; shapes are static)
# ----------------------------------------------------------------------------
def cnn_cell_forward(x, conv_w, conv_b, bn_gamma, bn_beta, bn_mean, bn_var,
                     bn_eps=1e-5):
    """CNNCell forward. x: (N, Cin, H, W) NCHW -> (N, Cout, H//2, W//2)."""
    N, Cin, H, W = x.shape
    Cout, Cin_w, kh, kw = conv_w.shape          # static shapes -> static ksize
    assert Cin == Cin_w
    assert kh % 2 == 1 and kw % 2 == 1, "padding='same' path assumes odd kernel"
    assert H % 2 == 0 and W % 2 == 0, "MaxPool2d(2) path assumes even H, W"
    pad_h, pad_w = kh // 2, kw // 2
    Hp, Wp = H // 2, W // 2
    K = kh * kw * Cin
    M = 4 * Hp * Wp

    # NCHW -> NHWC, spatial 'same' padding (pad widths are Python ints).
    x_nhwc = jnp.transpose(x, (0, 2, 3, 1))
    xp = jnp.pad(x_nhwc, ((0, 0), (pad_h, pad_h), (pad_w, pad_w), (0, 0)))

    # im2col: tap order (dh, dw, cin) on the last axis -> (N, H, W, K).
    taps = []
    for dh in range(kh):
        for dw in range(kw):
            taps.append(xp[:, dh:dh + H, dw:dw + W, :])
    patches = jnp.concatenate(taps, axis=-1)

    # 2x2 pooling phases stacked on the row axis, then transposed so the big
    # (phase, hp, wp) dimension lands on the lane axis of the matmul.
    phases = []
    for a in range(2):
        for b in range(2):
            phases.append(patches[:, a::2, b::2, :].reshape(N, Hp * Wp, K))
    p = jnp.stack(phases, axis=1).reshape(N, M, K)       # rows = (phase, hp, wp)
    p_t = jnp.transpose(p, (0, 2, 1))                    # (N, K, 4*Hp*Wp)

    # Fold eval-mode BatchNorm into the conv weight / bias (one-off, host side).
    scale = bn_gamma / jnp.sqrt(bn_var + bn_eps)         # (Cout,)
    shift = bn_beta - bn_mean * scale
    w_mat = jnp.transpose(conv_w, (2, 3, 1, 0)).reshape(K, Cout)   # tap-major
    w_t = jnp.transpose(w_mat * scale[None, :])          # (Cout, K), BN folded
    b_col = (conv_b * scale + shift).reshape(Cout, 1)    # (Cout, 1), BN folded

    out = pl.pallas_call(
        cnn_cell_kernel,
        out_shape=jax.ShapeDtypeStruct((N, Cout, Hp * Wp), jnp.float32),
        grid=(N,),
        in_specs=[
            pl.BlockSpec((None, K, M), lambda n: (n, 0, 0)),
            pl.BlockSpec((Cout, K), lambda n: (0, 0)),
            pl.BlockSpec((Cout, 1), lambda n: (0, 0)),
        ],
        out_specs=pl.BlockSpec((None, Cout, Hp * Wp), lambda n: (n, 0, 0)),
        compiler_params=pltpu.CompilerParams(
            dimension_semantics=("parallel",)),
    )(p_t, w_t, b_col)

    # Channel-major flat map -> NCHW. Pure reshape, no transpose.
    return out.reshape(N, Cout, Hp, Wp)


# ----------------------------------------------------------------------------
# Pure-JAX reference (same eval-mode semantics) for a correctness check
# ----------------------------------------------------------------------------
def cnn_cell_reference(x, conv_w, conv_b, bn_gamma, bn_beta, bn_mean, bn_var,
                       bn_eps=1e-5):
    y = jax.lax.conv_general_dilated(
        x, conv_w, window_strides=(1, 1), padding="SAME",
        dimension_numbers=("NCHW", "OIHW", "NCHW"),
        precision=jax.lax.Precision.HIGHEST)
    y = y + conv_b[None, :, None, None]
    scale = bn_gamma / jnp.sqrt(bn_var + bn_eps)
    shift = bn_beta - bn_mean * scale
    y = jnp.tanh(y * scale[None, :, None, None] + shift[None, :, None, None])
    N, C, H, W = y.shape
    return y.reshape(N, C, H // 2, 2, W // 2, 2).max(axis=(3, 5))


# ----------------------------------------------------------------------------
if __name__ == "__main__":
    key = jax.random.PRNGKey(0)
    kx, kw = jax.random.split(key)

    N, Cin, H, W = 2, 4, 16, 16
    Cout, ksize = 8, 3

    x = jax.random.normal(kx, (N, Cin, H, W), jnp.float32)

    # Xavier-uniform conv weight, zero bias (matches the PyTorch init).
    fan_in = Cin * ksize * ksize
    fan_out = Cout * ksize * ksize
    bound = math.sqrt(6.0 / (fan_in + fan_out))
    conv_w = jax.random.uniform(kw, (Cout, Cin, ksize, ksize), jnp.float32,
                                minval=-bound, maxval=bound)
    conv_b = jnp.zeros((Cout,), jnp.float32)
    # Freshly-initialized BatchNorm2d, eval mode.
    bn_gamma = jnp.ones((Cout,), jnp.float32)
    bn_beta = jnp.zeros((Cout,), jnp.float32)
    bn_mean = jnp.zeros((Cout,), jnp.float32)
    bn_var = jnp.ones((Cout,), jnp.float32)

    fwd = jax.jit(cnn_cell_forward)
    y = fwd(x, conv_w, conv_b, bn_gamma, bn_beta, bn_mean, bn_var)
    jax.block_until_ready(y)

    assert y.shape == (N, Cout, H // 2, W // 2), y.shape
    assert bool(jnp.all(jnp.isfinite(y)))

    y_ref = cnn_cell_reference(x, conv_w, conv_b, bn_gamma, bn_beta,
                               bn_mean, bn_var)
    max_err = float(jnp.max(jnp.abs(y - y_ref)))
    assert bool(jnp.allclose(y, y_ref, rtol=1e-3, atol=1e-3)), max_err

    print("KERNEL_OK")
</pallas_src>

<mosaic_0001>
module attributes {stable_mosaic.version = 11 : i64} {
  func.func @cnn_cell_kernel(%arg0: i32, %arg1: memref<1x36x256xf32, #tpu.memory_space<vmem>>, %arg2: memref<8x36xf32, #tpu.memory_space<vmem>>, %arg3: memref<8x1xf32, #tpu.memory_space<vmem>>, %arg4: memref<1x8x64xf32, #tpu.memory_space<vmem>>) attributes {dimension_semantics = [#tpu.dimension_semantics<parallel>], iteration_bounds = array<i64: 2>, scalar_prefetch = 0 : i64, scratch_operands = 0 : i64, tpu.core_type = #tpu.core_type<tc>, window_params = [{transform_indices = @transform_0, window_bounds = array<i64: 1, 36, 256>}, {pipeline_mode = #tpu.pipeline_mode<synchronous>, transform_indices = @transform_1, window_bounds = array<i64: 8, 36>}, {pipeline_mode = #tpu.pipeline_mode<synchronous>, transform_indices = @transform_2, window_bounds = array<i64: 8, 1>}, {transform_indices = @transform_3, window_bounds = array<i64: 1, 8, 64>}]} {
    %c0 = arith.constant 0 : index
    %c0_0 = arith.constant 0 : index
    %0 = vector.load %arg2[%c0, %c0_0] : memref<8x36xf32, #tpu.memory_space<vmem>>, vector<8x36xf32>
    %c0_1 = arith.constant 0 : index
    %c0_2 = arith.constant 0 : index
    %c0_3 = arith.constant 0 : index
    %1 = vector.load %arg1[%c0_1, %c0_2, %c0_3] : memref<1x36x256xf32, #tpu.memory_space<vmem>>, vector<1x36x256xf32>
    %2 = vector.shape_cast %1 : vector<1x36x256xf32> to vector<36x256xf32>
    %cst = arith.constant dense<0.000000e+00> : vector<8x256xf32>
    %3 = tpu.matmul %0, %2, %cst {dimension_numbers = #tpu.dot_dimension_numbers<[1], [0], [0], [1], [0, 0, 1, 1], [], []>} : vector<8x36xf32>, vector<36x256xf32>, vector<8x256xf32> -> vector<8x256xf32>
    %c0_4 = arith.constant 0 : index
    %c0_5 = arith.constant 0 : index
    %4 = vector.load %arg3[%c0_4, %c0_5] : memref<8x1xf32, #tpu.memory_space<vmem>>, vector<8x1xf32>
    %5 = vector.broadcast %4 : vector<8x1xf32> to vector<8x256xf32>
    %6 = arith.addf %3, %5 : vector<8x256xf32>
    %7 = math.tanh %6 : vector<8x256xf32>
    %8 = vector.extract_strided_slice %7 {offsets = [0, 0], sizes = [8, 64], strides = [1, 1]} : vector<8x256xf32> to vector<8x64xf32>
    %9 = vector.extract_strided_slice %7 {offsets = [0, 64], sizes = [8, 64], strides = [1, 1]} : vector<8x256xf32> to vector<8x64xf32>
    %10 = arith.maximumf %8, %9 : vector<8x64xf32>
    %11 = vector.extract_strided_slice %7 {offsets = [0, 128], sizes = [8, 64], strides = [1, 1]} : vector<8x256xf32> to vector<8x64xf32>
    %12 = vector.extract_strided_slice %7 {offsets = [0, 192], sizes = [8, 64], strides = [1, 1]} : vector<8x256xf32> to vector<8x64xf32>
    %13 = arith.maximumf %11, %12 : vector<8x64xf32>
    %14 = arith.maximumf %10, %13 : vector<8x64xf32>
    %c0_6 = arith.constant 0 : index
    %c0_7 = arith.constant 0 : index
    %c0_8 = arith.constant 0 : index
    %15 = vector.load %arg4[%c0_6, %c0_7, %c0_8] : memref<1x8x64xf32, #tpu.memory_space<vmem>>, vector<1x8x64xf32>
    %16 = vector.shape_cast %15 : vector<1x8x64xf32> to vector<8x64xf32>
    %17 = vector.shape_cast %14 : vector<8x64xf32> to vector<1x8x64xf32>
    tpu.vector_store %arg4[%c0_6, %c0_7, %c0_8], %17 {strides = array<i32>} : memref<1x8x64xf32, #tpu.memory_space<vmem>>, vector<1x8x64xf32>,
    return
  }
  func.func @transform_0(%arg0: i32) -> (i32, i32, i32) {
    %c0_i32 = arith.constant 0 : i32
    %c0_i32_0 = arith.constant 0 : i32
    %c0_i32_1 = arith.constant 0 : i32
    return %arg0, %c0_i32, %c0_i32_0 : i32, i32, i32
  }
  func.func @transform_1(%arg0: i32) -> (i32, i32) {
    %c0_i32 = arith.constant 0 : i32
    %c0_i32_0 = arith.constant 0 : i32
    %c0_i32_1 = arith.constant 0 : i32
    return %c0_i32, %c0_i32_0 : i32, i32
  }
  func.func @transform_2(%arg0: i32) -> (i32, i32) {
    %c0_i32 = arith.constant 0 : i32
    %c0_i32_0 = arith.constant 0 : i32
    %c0_i32_1 = arith.constant 0 : i32
    return %c0_i32, %c0_i32_0 : i32, i32
  }
  func.func @transform_3(%arg0: i32) -> (i32, i32, i32) {
    %c0_i32 = arith.constant 0 : i32
    %c0_i32_0 = arith.constant 0 : i32
    %c0_i32_1 = arith.constant 0 : i32
    return %arg0, %c0_i32, %c0_i32_0 : i32, i32, i32
  }
}

</mosaic_0001>

<bundles_post_ra>
// kernel: cnn_cell_forward.1
= control target key start
LH: loop header
LB: loop body
LE: loop exit
PB: predicated region body
PF: predicated region fallthrough
CT: control target
= control target key end

     0   :  { %s404_s12 = smov 0   ;;  %s431_s0 = inlined_call_operand.vmem [shape: f32[2,36,256], index: 0, kind: input, shape index: {}]   ;;  %s432_s1 = inlined_call_operand.vmem [shape: f32[8,36], index: 1, kind: input, shape index: {}]   ;;  %s433_s2 = inlined_call_operand.vmem [shape: f32[8,1], index: 2, kind: input, shape index: {}]   ;;  %s434_s3 = inlined_call_operand.vmem [shape: f32[2,8,64], index: 3, kind: output, shape index: {}]  }
   0x1 LB: > { %s336_s13 = sadd.s32 4294967295, %s379_s12   ;;  %p340_p0 = scmp.ge.s32.totalorder %s379_s12, 1  ;;  %s379_s12 = sphi %s404_s12, %s13_s12  }
   0x2   : > { %p137_p1 = scmp.lt.s32.totalorder %s379_s12, 3 }
   0x4   : > { %p138_p2 = pnand %p340_p0, %p137_p1 }
   0x5   : > { %p160_p3 = scmp.lt.s32.totalorder (!%p138_p2), %s336_s13, 1  ;;  %v381_v0 = vmov (!%p138_p2), 0.0   ;;  %v382_v1 = vmov (!%p138_p2), 0   ;;  %v180_v2 = vld [vmem:[%s433_s2] sm:$0xff] (!%p138_p2)  ;;  %vm190_vm0 = vcmask (!%p138_p2), 1043456   ;;  %vm186_vm1 = vcmask (!%p138_p2), 293888  }
   0x6   : > { %141 = sbr.rel (%p138_p2) target bundleno = 376 (0x178), region = 32  ;;  %261 = vmatprep.mubr.f32.mxu0 (!%p138_p2), %v381_v0  ;;  %368 = vset.pattern.permute.xlu0 (!%p138_p2), %v382_v1  ;;  %v169_v17 = vld [vmem:[%s432_s1] sm:$0xff] (!%p138_p2)  ;;  %s383_s22 = smov (!%p138_p2), 64   ;;  %vm281_vm2 = vcmask (!%p138_p2), 523264  }
   0x7   : > { %183 = vperm.xlu0 (!%p138_p2), %368, %v180_v2  }
   0xd   : > { %s436_s13 = smov (!%p160_p3, %s336_s13), 1 }
   0xe   : > { %s356_s16 = smul.u32 80, %s436_s13  ;;  %s342_s23 = sshll.u32 %s436_s13, 3 }
   0xf   : > { %s168_s26 = scalar_lea.vmem %s434_s3, %s342_s23 }
  0x10   : > { %s164_s19 = scalar_lea.vmem %s431_s0, %s356_s16 }
  0x11   : > { %v171_v3 = vld [vmem:[%s164_s19 + $0x8] sm:$0xff]  ;;  %v173_v4 = vld [vmem:[%s164_s19 + $0x18] sm:$0xff]  ;;  %v170_v5 = vld [vmem:[%s164_s19] sm:$0xff] }
  0x12   : > { %v348_v6 = vpack.c.bf16 %v173_v4, %v171_v3  ;;  %v172_v7 = vld [vmem:[%s164_s19 + $0x10] sm:$0xff]  ;;  %v175_v8 = vld [vmem:[%s164_s19 + $0x28] sm:$0xff]  ;;  %v177_v9 = vld [vmem:[%s164_s19 + $0x38] sm:$0xff] }
  0x13   : > { %v350_v10 = vpack.c.bf16 %v172_v7, %v170_v5  ;;  %v352_v11 = vpack.c.bf16 %v177_v9, %v175_v8  ;;  %v174_v12 = vld [vmem:[%s164_s19 + $0x20] sm:$0xff]  ;;  %v176_v13 = vld [vmem:[%s164_s19 + $0x30] sm:$0xff]  ;;  %v179_v15 = vld [vmem:[%s164_s19 + $0x48] sm:$0xf] }
  0x14   : > { %349 = vmatprep.subr.bf16.mxu0 %v348_v6  ;;  %v354_v14 = vpack.c.bf16 %v176_v13, %v174_v12  ;;  %v178_v16 = vld [vmem:[%s164_s19 + $0x40] sm:$0xf] }
  0x15   : > { %351 = vmatpush1.bf16.msra.mxu0 %v350_v10 }
  0x16   : > { %353 = vmatprep.subr.bf16.mxu0 %v352_v11 }
  0x19   : > { %355 = vmatpush1.bf16.msra.mxu0 %v354_v14 }
  0x1a   : > { %343 = vmatprep.subr.msk.mxu0 %vm190_vm0, %v179_v15 }
  0x1d   : > { %344 = vmatpush1.msk.msra.mxu0 %vm190_vm0, %v178_v16 }
  0x1e   : > { %345 = vmatmul.mubr.msk.f32.vlgmr.msra.gmra.mrb[0].mxu0 %vm186_vm1, %v169_v17 }
  0x86   : > { %v184_v18 = vpop.permute.xlu0 %183 }
  0xf1   : > { %v263_v19 = vpop.f32.mrb[0].mxu0 }
  0xf2   : > { %v264_v20 = vadd.f32 %v263_v19, %v184_v18  ;;  %v265_v21 = vpop.f32.mrb[1].mxu0 }
  0xf3   : > { %v266_v22 = vadd.f32 %v265_v21, %v184_v18 }
  0xf4   : > { %369 = vtanh.f32 %v264_v20 }
  0xf5   : > { %371 = vtanh.f32 %v266_v22 }
  0xfe   : > { %v370_v23 = vpop.eup %369 }
  0xff   : > { %v372_v24 = vpop.eup %371  ;;  %271 = vrot.lane.b32.xlu0 %v370_v23, %s383_s22 }
 0x100   : > { %276 = vrot.lane.b32.xlu1 %v372_v24, %s383_s22 }
 0x171   : > { %v272_v25 = vpop.permute.xlu0 %271 }
 0x172   : > { %v274_v26 = vmax.f32 %v370_v23, %v272_v25  ;;  %v277_v27 = vpop.permute.xlu1 %276 }
 0x173   : > { %v279_v28 = vmax.f32 %v372_v24, %v277_v27 }
 0x175   : > { %v280_v29 = vmax.f32 %v274_v26, %v279_v28 }
 0x177   : > { %282 = vst.msk [vmem:[%s168_s26] sm:$0xff] %vm281_vm2, %v280_v29 }
 0x178 PF: > { %s13_s12 = sadd.s32 1, %s379_s12  }
 0x179   : > { %p10_p4 = scmp.ge.s32.totalorder %s13_s12, 4  }
 0x17b   :  { %12 = sbr.rel (!%p10_p4) target bundleno = 1 (0x1), region = 62 }

</bundles_post_ra>
